<compile_context>
chip_gen: v7x
topology: tpu7x:2x2x1
jax: 0.10.0
libtpu: 0.0.40
codegen_flags: <defaults>
</compile_context>

<pallas_src>
import functools

import jax
import jax.numpy as jnp
from jax import lax
from jax.experimental import pallas as pl
from jax.experimental.pallas import tpu as pltpu


def _round_up(x: int, m: int) -> int:
    return (x + m - 1) // m * m


@functools.lru_cache(maxsize=1)
def _vmem_cap_bytes() -> int:
    """Per-generation scoped-VMEM ceiling (~90% of physical, fallback-safe)."""
    try:
        cap = int(pltpu.get_tpu_info().vmem_capacity_bytes)
    except Exception:  # pragma: no cover - query unavailable
        cap = 64 << 20  # conservative: v7x physical per-TC VMEM
    return max(int(cap * 0.9), 32 << 20)


def fuse_qkv_params(wq, bq, wk, bk, wv, bv, *, weight_dtype=None):
    """One-time parameter fusion (hoist out of the per-step call path).

    nn.Linear weights are (out, in); pre-transpose to canonical (K, N) so the
    kernel feeds the MXU directly with no per-iteration transpose.
      w_all: (3, D, D)  stacked [wq.T, wk.T, wv.T]
      b_all: (3, 1, D)  float32 biases (added in f32 inside the kernel)
    """
    w_all = jnp.stack([wq.T, wk.T, wv.T], axis=0)
    if weight_dtype is not None:
        w_all = w_all.astype(weight_dtype)
    b_all = jnp.stack([bq, bk, bv], axis=0).astype(jnp.float32)[:, None, :]
    return w_all, b_all


def _qkv_kernel(x_ref, w_ref, b_ref, q_ref, k_ref, v_ref):
    """One (row-tile, col-tile) of the q/k/v projection.

    x_ref:       (tm, D)     input rows (reused across the n axis)
    w_ref:       (3, D, tn)  [wq.T | wk.T | wv.T] column block, (K, N) layout
    b_ref:       (3, 1, tn)  f32 biases
    q/k/v_ref:   (tm, tn)    lane-dense output tiles
    """
    x = x_ref[...]
    for p, o_ref in enumerate((q_ref, k_ref, v_ref)):
        y = lax.dot_general(
            x, w_ref[p],
            dimension_numbers=(((1,), (0,)), ((), ())),
            preferred_element_type=jnp.float32,
        )
        o_ref[...] = (y + b_ref[p]).astype(o_ref.dtype)


@functools.partial(jax.jit, static_argnames=("tm", "activation_dtype"))
def multi_projection_fused(x, w_all, b_all, *, tm=512, activation_dtype=None):
    """x: (B, S, D); w_all: (3, D, D) in (K, N) layout; b_all: (3, 1, D) f32.

    Returns (q, k, v), each (B, S, D) in x.dtype, matching nn.Linear:
        q = x @ wq.T + bq ; k = x @ wk.T + bk ; v = x @ wv.T + bv
    """
    B, S, D = x.shape
    M = B * S
    out_dtype = x.dtype

    x2 = x.reshape(M, D)
    if activation_dtype is not None:
        x2 = x2.astype(activation_dtype)

    x_item = jnp.dtype(x2.dtype).itemsize
    w_item = jnp.dtype(w_all.dtype).itemsize
    o_item = jnp.dtype(out_dtype).itemsize
    cap = _vmem_cap_bytes()

    # --- Row tile: multiple of 8 (sublane), capped at (padded) M. ---
    tm_eff = _round_up(min(int(tm), _round_up(M, 8)), 8)
    m_pad = _round_up(M, tm_eff)
    if m_pad != M:
        x2 = jnp.pad(x2, ((0, m_pad - M), (0, 0)))

    # --- Column tile over D: keep the full weight resident when it fits,
    #     otherwise N-tile (streamed, double-buffered) in multiples of 128. ---
    w_budget = int(cap * 0.6)
    tn = D
    if 3 * D * D * w_item > w_budget and D % 128 == 0:
        candidates = [c for c in range(128, D + 1, 128)
                      if D % c == 0 and 2 * 3 * D * c * w_item <= w_budget]
        if candidates:
            tn = max(candidates)
        # TODO(synk): if even a (D, 128) weight column block does not fit,
        # also K-tile the contraction with an f32 accumulator scratch.
    n_tiles = D // tn
    grid = (m_pad // tm_eff, n_tiles)

    x_spec = pl.BlockSpec((tm_eff, D), lambda i, j: (i, 0))
    out_specs = [pl.BlockSpec((tm_eff, tn), lambda i, j: (i, j)) for _ in range(3)]
    out_shape = [jax.ShapeDtypeStruct((m_pad, D), out_dtype) for _ in range(3)]

    cost = pl.CostEstimate(
        flops=2 * m_pad * D * 3 * D,
        transcendentals=0,
        bytes_accessed=(m_pad * D * x_item + 3 * D * D * w_item
                        + 3 * D * 4 + 3 * m_pad * D * o_item),
    )

    def _run(single_buffer_resident):
        resident = single_buffer_resident and n_tiles == 1
        w_bufs = 1 if resident else 2
        if resident:
            w_spec = pl.BlockSpec((3, D, tn), lambda i, j: (0, 0, j),
                                  pipeline_mode=pl.Buffered(1))
            b_spec = pl.BlockSpec((3, 1, tn), lambda i, j: (0, 0, j),
                                  pipeline_mode=pl.Buffered(1))
        else:
            w_spec = pl.BlockSpec((3, D, tn), lambda i, j: (0, 0, j))
            b_spec = pl.BlockSpec((3, 1, tn), lambda i, j: (0, 0, j))

        # VMEM footprint: resident/streamed weight+bias buffers, double-buffered
        # x tile, and three double-buffered output tiles; +25% / +4 MiB headroom.
        need = (w_bufs * 3 * D * tn * w_item
                + w_bufs * 3 * _round_up(tn, 128) * 4
                + 2 * tm_eff * D * x_item
                + 3 * 2 * tm_eff * tn * o_item)
        vmem_limit = int(min(max(int(need * 1.25) + (4 << 20), 16 << 20), cap))

        return pl.pallas_call(
            _qkv_kernel,
            out_shape=out_shape,
            grid_spec=pltpu.PrefetchScalarGridSpec(
                num_scalar_prefetch=0,
                grid=grid,
                in_specs=[x_spec, w_spec, b_spec],
                out_specs=out_specs,
            ),
            compiler_params=pltpu.CompilerParams(
                dimension_semantics=("parallel", "parallel"),
                vmem_limit_bytes=vmem_limit,
            ),
            cost_estimate=cost,
        )(x2, w_all, b_all)

    try:
        q2, k2, v2 = _run(True)
    except Exception:  # pragma: no cover - pipeline_mode=Buffered(1) unsupported
        q2, k2, v2 = _run(False)

    q = q2[:M].reshape(B, S, D)
    k = k2[:M].reshape(B, S, D)
    v = v2[:M].reshape(B, S, D)
    return q, k, v


def multi_projection(x, wq, bq, wk, bk, wv, bv, *, tm=512, use_bf16=False):
    """Convenience wrapper (fuses params per call). Prefer calling
    fuse_qkv_params() once and multi_projection_fused() per step."""
    dt = jnp.bfloat16 if use_bf16 else None
    w_all, b_all = fuse_qkv_params(wq, bq, wk, bk, wv, bv, weight_dtype=dt)
    return multi_projection_fused(x, w_all, b_all, tm=tm, activation_dtype=dt)


if __name__ == "__main__":
    # Small config consistent with the module: B=2, S=8, hidden=32.
    B, S, D = 2, 8, 32
    key = jax.random.PRNGKey(0)
    kx, kq, kk, kv, kbq, kbk, kbv = jax.random.split(key, 7)

    x = jax.random.normal(kx, (B, S, D), dtype=jnp.float32)

    # Deterministic nn.Linear-style uniform init (bound 1/sqrt(D)).
    bound = 1.0 / (D ** 0.5)
    wq = jax.random.uniform(kq, (D, D), jnp.float32, -bound, bound)
    wk = jax.random.uniform(kk, (D, D), jnp.float32, -bound, bound)
    wv = jax.random.uniform(kv, (D, D), jnp.float32, -bound, bound)
    bq = jax.random.uniform(kbq, (D,), jnp.float32, -bound, bound)
    bk = jax.random.uniform(kbk, (D,), jnp.float32, -bound, bound)
    bv = jax.random.uniform(kbv, (D,), jnp.float32, -bound, bound)

    # Fuse parameters once (hoisted out of the per-step path), then run.
    w_all, b_all = fuse_qkv_params(wq, bq, wk, bk, wv, bv)
    q, k, v = multi_projection_fused(x, w_all, b_all)
    jax.block_until_ready((q, k, v))

    # Pure-JAX reference (nn.Linear semantics: y = x @ W.T + b).
    q_ref = x @ wq.T + bq
    k_ref = x @ wk.T + bk
    v_ref = x @ wv.T + bv
    assert jnp.allclose(q, q_ref, atol=1e-4, rtol=1e-4), "q mismatch"
    assert jnp.allclose(k, k_ref, atol=1e-4, rtol=1e-4), "k mismatch"
    assert jnp.allclose(v, v_ref, atol=1e-4, rtol=1e-4), "v mismatch"

    print("KERNEL_OK")
</pallas_src>

<mosaic_0001>
module attributes {stable_mosaic.version = 11 : i64} {
  func.func @_qkv_kernel(%arg0: i32, %arg1: i32, %arg2: memref<16x32xf32, #tpu.memory_space<vmem>>, %arg3: memref<3x32x32xf32, #tpu.memory_space<vmem>>, %arg4: memref<3x1x32xf32, #tpu.memory_space<vmem>>, %arg5: memref<16x32xf32, #tpu.memory_space<vmem>>, %arg6: memref<16x32xf32, #tpu.memory_space<vmem>>, %arg7: memref<16x32xf32, #tpu.memory_space<vmem>>) attributes {dimension_semantics = [#tpu.dimension_semantics<parallel>, #tpu.dimension_semantics<parallel>], iteration_bounds = array<i64: 1, 1>, scalar_prefetch = 0 : i64, scratch_operands = 0 : i64, tpu.core_type = #tpu.core_type<tc>, window_params = [{transform_indices = @transform_0, window_bounds = array<i64: 16, 32>}, {pipeline_mode = #tpu.pipeline_mode<synchronous>, transform_indices = @transform_1, window_bounds = array<i64: 3, 32, 32>}, {pipeline_mode = #tpu.pipeline_mode<synchronous>, transform_indices = @transform_2, window_bounds = array<i64: 3, 1, 32>}, {transform_indices = @transform_3, window_bounds = array<i64: 16, 32>}, {transform_indices = @transform_4, window_bounds = array<i64: 16, 32>}, {transform_indices = @transform_5, window_bounds = array<i64: 16, 32>}]} {
    %c0 = arith.constant 0 : index
    %c0_0 = arith.constant 0 : index
    %0 = vector.load %arg2[%c0, %c0_0] : memref<16x32xf32, #tpu.memory_space<vmem>>, vector<16x32xf32>
    %c0_1 = arith.constant 0 : index
    %c0_2 = arith.constant 0 : index
    %c0_3 = arith.constant 0 : index
    %1 = vector.load %arg3[%c0_1, %c0_2, %c0_3] : memref<3x32x32xf32, #tpu.memory_space<vmem>>, vector<1x32x32xf32>
    %2 = vector.shape_cast %1 : vector<1x32x32xf32> to vector<32x32xf32>
    %cst = arith.constant dense<0.000000e+00> : vector<16x32xf32>
    %3 = tpu.matmul %0, %2, %cst {dimension_numbers = #tpu.dot_dimension_numbers<[1], [0], [0], [1], [0, 0, 1, 1], [], []>} : vector<16x32xf32>, vector<32x32xf32>, vector<16x32xf32> -> vector<16x32xf32>
    %c0_4 = arith.constant 0 : index
    %c0_5 = arith.constant 0 : index
    %c0_6 = arith.constant 0 : index
    %4 = vector.load %arg4[%c0_4, %c0_5, %c0_6] : memref<3x1x32xf32, #tpu.memory_space<vmem>>, vector<1x1x32xf32>
    %5 = vector.shape_cast %4 : vector<1x1x32xf32> to vector<1x32xf32>
    %6 = vector.broadcast %5 : vector<1x32xf32> to vector<16x32xf32>
    %7 = arith.addf %3, %6 : vector<16x32xf32>
    %c0_7 = arith.constant 0 : index
    %c0_8 = arith.constant 0 : index
    %8 = vector.load %arg5[%c0_7, %c0_8] : memref<16x32xf32, #tpu.memory_space<vmem>>, vector<16x32xf32>
    tpu.vector_store %arg5[%c0_7, %c0_8], %7 {strides = array<i32>} : memref<16x32xf32, #tpu.memory_space<vmem>>, vector<16x32xf32>,
    %c1 = arith.constant 1 : index
    %c0_9 = arith.constant 0 : index
    %c0_10 = arith.constant 0 : index
    %9 = vector.load %arg3[%c1, %c0_9, %c0_10] : memref<3x32x32xf32, #tpu.memory_space<vmem>>, vector<1x32x32xf32>
    %10 = vector.shape_cast %9 : vector<1x32x32xf32> to vector<32x32xf32>
    %cst_11 = arith.constant dense<0.000000e+00> : vector<16x32xf32>
    %11 = tpu.matmul %0, %10, %cst_11 {dimension_numbers = #tpu.dot_dimension_numbers<[1], [0], [0], [1], [0, 0, 1, 1], [], []>} : vector<16x32xf32>, vector<32x32xf32>, vector<16x32xf32> -> vector<16x32xf32>
    %c1_12 = arith.constant 1 : index
    %c0_13 = arith.constant 0 : index
    %c0_14 = arith.constant 0 : index
    %12 = vector.load %arg4[%c1_12, %c0_13, %c0_14] : memref<3x1x32xf32, #tpu.memory_space<vmem>>, vector<1x1x32xf32>
    %13 = vector.shape_cast %12 : vector<1x1x32xf32> to vector<1x32xf32>
    %14 = vector.broadcast %13 : vector<1x32xf32> to vector<16x32xf32>
    %15 = arith.addf %11, %14 : vector<16x32xf32>
    %c0_15 = arith.constant 0 : index
    %c0_16 = arith.constant 0 : index
    %16 = vector.load %arg6[%c0_15, %c0_16] : memref<16x32xf32, #tpu.memory_space<vmem>>, vector<16x32xf32>
    tpu.vector_store %arg6[%c0_15, %c0_16], %15 {strides = array<i32>} : memref<16x32xf32, #tpu.memory_space<vmem>>, vector<16x32xf32>,
    %c2 = arith.constant 2 : index
    %c0_17 = arith.constant 0 : index
    %c0_18 = arith.constant 0 : index
    %17 = vector.load %arg3[%c2, %c0_17, %c0_18] : memref<3x32x32xf32, #tpu.memory_space<vmem>>, vector<1x32x32xf32>
    %18 = vector.shape_cast %17 : vector<1x32x32xf32> to vector<32x32xf32>
    %cst_19 = arith.constant dense<0.000000e+00> : vector<16x32xf32>
    %19 = tpu.matmul %0, %18, %cst_19 {dimension_numbers = #tpu.dot_dimension_numbers<[1], [0], [0], [1], [0, 0, 1, 1], [], []>} : vector<16x32xf32>, vector<32x32xf32>, vector<16x32xf32> -> vector<16x32xf32>
    %c2_20 = arith.constant 2 : index
    %c0_21 = arith.constant 0 : index
    %c0_22 = arith.constant 0 : index
    %20 = vector.load %arg4[%c2_20, %c0_21, %c0_22] : memref<3x1x32xf32, #tpu.memory_space<vmem>>, vector<1x1x32xf32>
    %21 = vector.shape_cast %20 : vector<1x1x32xf32> to vector<1x32xf32>
    %22 = vector.broadcast %21 : vector<1x32xf32> to vector<16x32xf32>
    %23 = arith.addf %19, %22 : vector<16x32xf32>
    %c0_23 = arith.constant 0 : index
    %c0_24 = arith.constant 0 : index
    %24 = vector.load %arg7[%c0_23, %c0_24] : memref<16x32xf32, #tpu.memory_space<vmem>>, vector<16x32xf32>
    tpu.vector_store %arg7[%c0_23, %c0_24], %23 {strides = array<i32>} : memref<16x32xf32, #tpu.memory_space<vmem>>, vector<16x32xf32>,
    return
  }
  func.func @transform_0(%arg0: i32, %arg1: i32) -> (i32, i32) {
    %c0_i32 = arith.constant 0 : i32
    %c0_i32_0 = arith.constant 0 : i32
    return %arg0, %c0_i32 : i32, i32
  }
  func.func @transform_1(%arg0: i32, %arg1: i32) -> (i32, i32, i32) {
    %c0_i32 = arith.constant 0 : i32
    %c0_i32_0 = arith.constant 0 : i32
    %c0_i32_1 = arith.constant 0 : i32
    return %c0_i32, %c0_i32_0, %arg1 : i32, i32, i32
  }
  func.func @transform_2(%arg0: i32, %arg1: i32) -> (i32, i32, i32) {
    %c0_i32 = arith.constant 0 : i32
    %c0_i32_0 = arith.constant 0 : i32
    %c0_i32_1 = arith.constant 0 : i32
    return %c0_i32, %c0_i32_0, %arg1 : i32, i32, i32
  }
  func.func @transform_3(%arg0: i32, %arg1: i32) -> (i32, i32) {
    %c0_i32 = arith.constant 0 : i32
    return %arg0, %arg1 : i32, i32
  }
  func.func @transform_4(%arg0: i32, %arg1: i32) -> (i32, i32) {
    %c0_i32 = arith.constant 0 : i32
    return %arg0, %arg1 : i32, i32
  }
  func.func @transform_5(%arg0: i32, %arg1: i32) -> (i32, i32) {
    %c0_i32 = arith.constant 0 : i32
    return %arg0, %arg1 : i32, i32
  }
}

</mosaic_0001>

<bundles_post_ra>
// kernel: multi_projection_fused.1
= control target key start
LH: loop header
LB: loop body
LE: loop exit
PB: predicated region body
PF: predicated region fallthrough
CT: control target
= control target key end

     0   :  { %11 = vsyncpa [#allocation3], 0  ;;  %s724_s0 = inlined_call_operand.hbm [shape: f32[16,32], index: 0, kind: input, shape index: {}]   ;;  %s725_s1 = inlined_call_operand.hbm [shape: f32[3,32,32], index: 1, kind: input, shape index: {}]   ;;  %s726_s2 = inlined_call_operand.vmem [shape: f32[3,1,32], index: 2, kind: input, shape index: {}]   ;;  %s727_s3 = inlined_call_operand.hbm [shape: f32[16,32], index: 3, kind: output, shape index: {0}]   ;;  %s728_s4 = inlined_call_operand.hbm [shape: f32[16,32], index: 4, kind: output, shape index: {1}]   ;;  %s729_s5 = inlined_call_operand.hbm [shape: f32[16,32], index: 5, kind: output, shape index: {2}]  }
   0x1   :  { %12 = vsyncpa [#allocation6], 0 }
   0x2   :  { %13 = vsyncpa [#allocation4], 0 }
   0x3   :  { %14 = vsyncpa [#allocation9], 0  ;;  %s584_s18 = smov [#allocation2]   ;;  %s466_s22 = scalar_lea.hbm %s724_s0, 256 }
   0x4   :  { %s20_s19 = sshll.u32 %s584_s18, 4  ;;  %p467_p0 = scmp.ne.s32.totalorder %s724_s0, %s466_s22  ;;  %s21_s19 = int_to_ptr.vmem [resolvable:$true] %s20_s19 }
   0x5   :  { %p470_p1 = scmp.lt.u32.totalorder %s466_s22, %s724_s0 }
   0x7   :  { %p472_p2 = pnand %p470_p1, %p467_p0 }
   0x9   :  { %475 = shalt.err (!%p472_p2)
}
   0xa   :  { %s476_s27 = scalar_lea.vmem %s21_s19, 256  ;;  %p481_p4 = scmp.lt.s32.totalorder %s21_s19, %s21_s19 }
   0xb   :  { %p477_p3 = scmp.ne.s32.totalorder %s21_s19, %s476_s27  ;;  %p482_p5 = scmp.lt.s32.totalorder %s476_s27, %s476_s27 }
   0xd   :  { %p483_p6 = por %p482_p5, %p481_p4 }
   0xf   :  { %p484_p7 = pnand %p483_p6, %p477_p3 }
  0x11   :  { %487 = shalt.err (!%p484_p7)
}
  0x12   :  { %s585_s28 = smov 128   ;;  %s586_s29 = smov 8  }
  0x13   :  { %26 = dma.hbm_to_vmem [thread:$0]  %s724_s0, 256, %s21_s19, [#allocation3], %s585_s28, %s585_s28, %s586_s29  }
  0x14   :  { %s587_s7 = smov [#allocation5]   ;;  %s488_s11 = scalar_lea.hbm %s725_s1, 1536 }
  0x15   :  { %s32_s8 = sshll.u32 %s587_s7, 4  ;;  %p489_p8 = scmp.ne.s32.totalorder %s725_s1, %s488_s11  ;;  %s33_s8 = int_to_ptr.vmem [resolvable:$true] %s32_s8 }
  0x16   :  { %p492_p9 = scmp.lt.u32.totalorder %s488_s11, %s725_s1 }
  0x18   :  { %p494_p10 = pnand %p492_p9, %p489_p8 }
  0x1a   :  { %497 = shalt.err (!%p494_p10)
}
  0x1b   :  { %s498_s16 = scalar_lea.vmem %s33_s8, 1536  ;;  %p503_p12 = scmp.lt.s32.totalorder %s33_s8, %s33_s8 }
  0x1c   :  { %p499_p11 = scmp.ne.s32.totalorder %s33_s8, %s498_s16  ;;  %p504_p13 = scmp.lt.s32.totalorder %s498_s16, %s498_s16 }
  0x1e   :  { %p505_p0 = por %p504_p13, %p503_p12 }
  0x20   :  { %p506_p1 = pnand %p505_p0, %p499_p11 }
  0x22   :  { %509 = shalt.err (!%p506_p1)
}
  0x23   :  { %38 = dma.hbm_to_vmem [thread:$0]  %s725_s1, 1536, %s33_s8, [#allocation6], %s585_s28, %s585_s28, %s586_s29  }
  0x24   :  { %576 = dma.done.wait [#allocation3], 256  }
  0x25   :  { %577 = vsyncadd [#allocation3], 4294967040 }
  0x26   :  { %578 = dma.done.wait [#allocation6], 1536  }
  0x27   :  { %579 = vsyncadd [#allocation6], 4294965760  ;;  %v49_v0 = vld [vmem:[#allocation5] sm:$0xff]  ;;  %v50_v1 = vld [vmem:[#allocation5 + $0x8] sm:$0xff]  ;;  %vm60_vm0 = vcmask 261120   ;;  %s588_s21 = smov [#allocation7]  }
  0x28   :  { %v51_v2 = vld [vmem:[#allocation5 + $0x10] sm:$0xff]  ;;  %v435_v3 = vpack.c.bf16 %v50_v1, %v49_v0  ;;  %v52_v4 = vld [vmem:[#allocation5 + $0x18] sm:$0xff]  ;;  %v145_v5 = vld [vmem:[#allocation5 + $0x20] sm:$0xff]  ;;  %s329_s22 = sshll.u32 %s588_s21, 4  ;;  %s589_s23 = smov [#allocation8]   ;;  %s330_s22 = int_to_ptr.vmem [resolvable:$true] %s329_s22 }
  0x29   :  { %v146_v6 = vld [vmem:[#allocation5 + $0x28] sm:$0xff]  ;;  %v439_v7 = vpack.c.bf16 %v52_v4, %v51_v2  ;;  %v47_v9 = vld [vmem:[#allocation2] sm:$0xff]  ;;  %v235_v10 = vld [vmem:[#allocation5 + $0x40] sm:$0xff]  ;;  %s341_s24 = sshll.u32 %s589_s23, 4  ;;  %s510_s27 = scalar_lea.vmem %s330_s22, 256  ;;  %s664_s24 = int_to_ptr.vmem [resolvable:$true] %s341_s24 }
  0x2a   :  { %v443_v8 = vpack.c.bf16 %v146_v6, %v145_v5  ;;  %436 = vmatprep.subr.bf16.mxu0 %v435_v3  ;;  %410 = vmatprep.mubr.msk.f32.mxu0 %vm60_vm0, %v47_v9  ;;  %v236_v11 = vld [vmem:[#allocation5 + $0x48] sm:$0xff]  ;;  %v147_v12 = vld [vmem:[#allocation5 + $0x30] sm:$0xff]  ;;  %v148_v13 = vld [vmem:[#allocation5 + $0x38] sm:$0xff]  ;;  %p511_p2 = scmp.ne.s32.totalorder %s330_s22, %s510_s27  ;;  %p515_p3 = scmp.lt.s32.totalorder %s330_s22, %s330_s22 }
  0x2b   :  { %438 = vmatpush3.bf16.msra.mxu0 %v435_v3  ;;  %v447_v14 = vpack.c.bf16 %v148_v13, %v147_v12  ;;  %v451_v15 = vpack.c.bf16 %v236_v11, %v235_v10  ;;  %v237_v16 = vld [vmem:[#allocation5 + $0x50] sm:$0xff]  ;;  %v238_v17 = vld [vmem:[#allocation5 + $0x58] sm:$0xff]  ;;  %421 = vmatprep.mubr.msk.f32.mxu1 %vm60_vm0, %v47_v9  ;;  %p516_p4 = scmp.lt.s32.totalorder %s510_s27, %s510_s27 }
  0x2c   :  { %444 = vmatprep.subr.bf16.mxu1 %v443_v8  ;;  %440 = vmatprep.subr.bf16.mxu0 %v439_v7  ;;  %v48_v18 = vld [vmem:[#allocation2 + $0x8] sm:$0xff]  ;;  %v455_v19 = vpack.c.bf16 %v238_v17, %v237_v16  ;;  %v373_v20 = vld [vmem:[%s726_s2] ss:$0 sm:$0xff]  ;;  %v377_v21 = vld [vmem:[%s726_s2 + $0x1] ss:$0 sm:$0xff] }
  0x2d   :  { %446 = vmatpush3.bf16.msra.mxu1 %v443_v8  ;;  %v381_v30 = vld [vmem:[%s726_s2 + $0x2] ss:$0 sm:$0xff]  ;;  %p517_p5 = por %p516_p4, %p515_p3 }
  0x2e   :  { %448 = vmatprep.subr.bf16.mxu1 %v447_v14 }
  0x2f   :  { %442 = vmatpush3.bf16.msra.mxu0 %v439_v7  ;;  %p518_p6 = pnand %p517_p5, %p511_p2 }
  0x30   :  { %452 = vmatprep.subr.bf16.mxu0 %v451_v15 }
  0x31   :  { %450 = vmatpush3.bf16.msra.mxu1 %v447_v14 }
  0x32   :  { %411 = vmatmul.mubr.msk.f32.vlgmr.msra.gmra.mrb[0].mxu0 %vm60_vm0, %v48_v18 }
  0x33   :  { %454 = vmatpush3.bf16.msra.mxu0 %v451_v15  ;;  %432 = vmatprep.mubr.msk.f32.mxu0 %vm60_vm0, %v47_v9 }
  0x34   :  { %422 = vmatmul.mubr.msk.f32.vlgmr.msra.gmra.mrb[0].mxu1 %vm60_vm0, %v48_v18  ;;  %456 = vmatprep.subr.bf16.mxu0 %v455_v19 }
  0x37   :  { %458 = vmatpush3.bf16.msra.mxu0 %v455_v19 }
  0x3a   :  { %433 = vmatmul.mubr.msk.f32.vlgmr.msra.gmra.mrb[2].mxu0 %vm60_vm0, %v48_v18 }
 0x105   :  { %v412_v22 = vpop.f32.mrb[0].mxu0 }
 0x106   :  { %v139_v23 = vadd.f32 %v412_v22, %v373_v20  ;;  %v133_v24 = vpop.f32.mrb[1].mxu0 }
 0x107   :  { %v423_v25 = vpop.f32.mrb[0].mxu1  ;;  %v134_v26 = vadd.f32 %v373_v20, %v133_v24 }
 0x108   :  { %v229_v27 = vadd.f32 %v423_v25, %v377_v21  ;;  %v223_v28 = vpop.f32.mrb[1].mxu1  ;;  %143 = vst.msk [vmem:[#allocation7 + $0x8] sm:$0xff] %vm60_vm0, %v139_v23 }
 0x109   :  { %v224_v29 = vadd.f32 %v377_v21, %v223_v28  ;;  %142 = vst.msk [vmem:[#allocation7] sm:$0xff] %vm60_vm0, %v134_v26 }
 0x10a   :  { %233 = vst.msk [vmem:[#allocation8 + $0x8] sm:$0xff] %vm60_vm0, %v229_v27 }
 0x10b   :  { %232 = vst.msk [vmem:[#allocation8] sm:$0xff] %vm60_vm0, %v224_v29 }
 0x10c   :  { %521 = shalt.err (!%p518_p6)
}
 0x10d   :  { %s522_s7 = scalar_lea.hbm %s727_s3, 256 }
 0x10e   :  { %p523_p7 = scmp.ne.s32.totalorder %s727_s3, %s522_s7  ;;  %p526_p8 = scmp.lt.u32.totalorder %s522_s7, %s727_s3 }
 0x110   :  { %p528_p9 = pnand %p526_p8, %p523_p7 }
 0x112   :  { %531 = shalt.err (!%p528_p9)
}
 0x113   :  { %335 = dma.vmem_to_hbm [thread:$0]  %s330_s22, 256, %s727_s3, [#allocation4], %s585_s28, %s585_s28, %s586_s29  }
 0x114   :  { %s532_s13 = scalar_lea.vmem %s664_s24, 256  ;;  %p537_p11 = scmp.lt.s32.totalorder %s664_s24, %s664_s24 }
 0x115   :  { %p533_p10 = scmp.ne.s32.totalorder %s664_s24, %s532_s13  ;;  %p538_p12 = scmp.lt.s32.totalorder %s532_s13, %s532_s13 }
 0x117   :  { %p539_p13 = por %p538_p12, %p537_p11 }
 0x119   :  { %p540_p0 = pnand %p539_p13, %p533_p10 }
 0x11b   :  { %543 = shalt.err (!%p540_p0)
}
 0x11c   :  { %s544_s16 = scalar_lea.hbm %s728_s4, 256 }
 0x11d   :  { %p545_p1 = scmp.ne.s32.totalorder %s728_s4, %s544_s16  ;;  %p548_p2 = scmp.lt.u32.totalorder %s544_s16, %s728_s4 }
 0x11f   :  { %p550_p3 = pnand %p548_p2, %p545_p1 }
 0x121   :  { %553 = shalt.err (!%p550_p3)
}
 0x122   :  { %347 = dma.vmem_to_hbm [thread:$0]  %s664_s24, 256, %s728_s4, [#allocation9], %s585_s28, %s585_s28, %s586_s29   ;;  %v434_v31 = vpop.f32.mrb[2].mxu0 }
 0x123   :  { %s590_s20 = smov [#allocation10]   ;;  %v319_v32 = vadd.f32 %v434_v31, %v381_v30  ;;  %v313_v33 = vpop.f32.mrb[3].mxu0 }
 0x124   :  { %s353_s21 = sshll.u32 %s590_s20, 4  ;;  %v314_v34 = vadd.f32 %v381_v30, %v313_v33  ;;  %s354_s21 = int_to_ptr.vmem [resolvable:$true] %s353_s21 }
 0x125   :  { %323 = vst.msk [vmem:[#allocation10 + $0x8] sm:$0xff] %vm60_vm0, %v319_v32  ;;  %s554_s22 = scalar_lea.vmem %s354_s21, 256  ;;  %p559_p5 = scmp.lt.s32.totalorder %s354_s21, %s354_s21 }
 0x126   :  { %322 = vst.msk [vmem:[#allocation10] sm:$0xff] %vm60_vm0, %v314_v34  ;;  %p555_p4 = scmp.ne.s32.totalorder %s354_s21, %s554_s22  ;;  %p560_p6 = scmp.lt.s32.totalorder %s554_s22, %s554_s22 }
 0x128   :  { %p561_p7 = por %p560_p6, %p559_p5 }
 0x12a   :  { %p562_p8 = pnand %p561_p7, %p555_p4 }
 0x12c   :  { %565 = shalt.err (!%p562_p8)
}
 0x12d   :  { %s566_s24 = scalar_lea.hbm %s729_s5, 256 }
 0x12e   :  { %p567_p9 = scmp.ne.s32.totalorder %s729_s5, %s566_s24  ;;  %p570_p10 = scmp.lt.u32.totalorder %s566_s24, %s729_s5 }
 0x130   :  { %p572_p11 = pnand %p570_p10, %p567_p9 }
 0x132   :  { %575 = shalt.err (!%p572_p11)
}
 0x133   :  { %359 = dma.vmem_to_hbm [thread:$0]  %s354_s21, 256, %s729_s5, [#allocation9], %s585_s28, %s585_s28, %s586_s29  }
 0x134   :  { %580 = dma.done.wait [#allocation4], 256  }
 0x135   :  { %581 = vsyncadd [#allocation4], 4294967040 }
 0x136   :  { %582 = dma.done.wait [#allocation9], 512  }
 0x137   :  { %583 = vsyncadd [#allocation9], 4294966784 }
 0x138   :  { %369 = vsyncpa [#allocation3], 1 }
 0x139   :  { %370 = vsyncpa [#allocation6], 1 }
 0x13a   :  { %371 = vsyncpa [#allocation4], 1 }
 0x13b   :  { %372 = vsyncpa [#allocation9], 1 }

</bundles_post_ra>
